<compile_context>
chip_gen: v7x
topology: tpu7x:2x2x1
jax: 0.10.0
libtpu: 0.0.40
codegen_flags: <defaults>
</compile_context>

<pallas_src>
import jax
import jax.numpy as jnp
from jax.experimental import pallas as pl
from jax.experimental.pallas import tpu as pltpu


def _attention_kernel(x_ref, wt_ref, b_ref, v_ref, ctx_ref):
    # x_ref:  (Bt, S, H) block of RNN outputs for Bt batch elements
    # wt_ref: (H, H)     = W^T of nn.Linear(hidden, hidden)  (matmul dtype)
    # b_ref:  (1, H)     Linear bias (f32)
    # v_ref:  (1, H)     attention vector v (f32)
    # ctx_ref:(Bt, H)    output context vectors (f32)
    Bt, S, H = x_ref.shape

    x = x_ref[...]                                    # (Bt, S, H)
    x_f32 = x.astype(jnp.float32)

    # Merge (Bt, S) -> rows while still in the stored dtype so the reshape is
    # a layout no-op for S % sublane == 0; then cast to the matmul dtype.
    x2 = x.reshape(Bt * S, H).astype(wt_ref.dtype)    # (Bt*S, H)

    # Linear + tanh: one big M = Bt*S matmul on the MXU (bf16 operands,
    # f32 accumulate); bias add on VPU, tanh on EUP, all in f32.
    energy = jnp.tanh(
        jnp.dot(x2, wt_ref[...], preferred_element_type=jnp.float32)
        + b_ref[...]
    )                                                 # (Bt*S, H) f32
    energy3 = energy.reshape(Bt, S, H)

    # scores[b, s] = v . energy[b, s, :]  -> dense lane reduction over H,
    # result has S on the lane axis.
    scores = jnp.sum(energy3 * v_ref[...], axis=-1)   # (Bt, S) f32

    # softmax over the sequence (lane) axis — exact division (the approximate
    # reciprocal previously introduced ~2e-3 absolute error in the context).
    m = jnp.max(scores, axis=-1, keepdims=True)       # (Bt, 1)
    e = jnp.exp(scores - m)                           # (Bt, S)
    weights = e / jnp.sum(e, axis=-1, keepdims=True)  # (Bt, S)

    # context[b, :] = sum_s weights[b, s] * x[b, s, :]  (kept in f32)
    ctx = jnp.einsum(
        "bqs,bsh->bqh", weights[:, None, :], x_f32,
        preferred_element_type=jnp.float32,
    )[:, 0, :]                                        # (Bt, H)

    ctx_ref[...] = ctx.astype(ctx_ref.dtype)


def _choose_block_b(B, S, H, x_itemsize):
    """Batch rows per grid step, sized against a VMEM byte budget."""
    # ~3 MiB per pipeline buffer for the x slab keeps the total footprint
    # (2x double-buffered x + bf16 copy + f32 energy temporary + weights/out)
    # comfortably inside 16-32 MiB of scoped VMEM on every generation while
    # staying near the HBM roofline (multi-MiB tiles measure ~85% of peak).
    per_buffer_budget = 3 * 1024 * 1024
    row_bytes = S * H * x_itemsize
    block_b = max(1, per_buffer_budget // row_bytes)
    block_b = min(block_b, B)
    # Let the "parallel" batch axis shard across v7x's two TensorCores when
    # the batch is large enough that halving keeps the blocks well-shaped.
    if B >= 16 and block_b > pl.cdiv(B, 2):
        block_b = pl.cdiv(B, 2)
    # Keep the (block_b, H) output block sublane-aligned when possible.
    if block_b >= 8:
        block_b -= block_b % 8
    return block_b


def attention_pallas(output, w, b, v, *, block_b=None,
                     compute_dtype=jnp.bfloat16):
    """output: (B, S, H); w: (H, H) Linear weight (torch layout: y = x@W^T+b);
    b: (H,); v: (H,). Returns context (B, H) in f32.

    `compute_dtype` is the MXU operand dtype for the Linear matmul
    (bf16 by default: native MXU rate on v5e/v6e/v7x, f32 accumulation)."""
    B, S, H = output.shape

    # Keep bf16 inputs as bf16 (halves x HBM traffic); anything else -> f32.
    x_dtype = jnp.bfloat16 if output.dtype == jnp.bfloat16 else jnp.float32
    x = jnp.asarray(output, x_dtype)
    x_itemsize = jnp.dtype(x_dtype).itemsize

    if block_b is None:
        block_b = _choose_block_b(B, S, H, x_itemsize)
    block_b = max(1, min(block_b, B))
    num_blocks = pl.cdiv(B, block_b)   # ragged last block handled by Pallas

    wt = jnp.asarray(w, jnp.float32).T.astype(compute_dtype)   # (H, H)
    b2 = jnp.asarray(b, jnp.float32).reshape(1, H)
    v2 = jnp.asarray(v, jnp.float32).reshape(1, H)

    # Weights/bias/v use a constant index_map -> resident, never re-DMA'd.
    # Single-buffer a large resident weight so it doesn't double its VMEM cost.
    w_spec_kwargs = {}
    if H * H * jnp.dtype(compute_dtype).itemsize > (2 << 20):
        w_spec_kwargs["pipeline_mode"] = pl.Buffered(1)
    w_spec = pl.BlockSpec((H, H), lambda i: (0, 0), **w_spec_kwargs)

    cost = pl.CostEstimate(
        flops=2 * B * S * H * H + 8 * B * S * H,
        transcendentals=B * S * H + B * S,
        bytes_accessed=(B * S * H * x_itemsize
                        + H * H * jnp.dtype(compute_dtype).itemsize
                        + 2 * H * 4 + B * H * 4),
    )

    ctx = pl.pallas_call(
        _attention_kernel,
        out_shape=jax.ShapeDtypeStruct((B, H), jnp.float32),
        grid_spec=pltpu.PrefetchScalarGridSpec(
            num_scalar_prefetch=0,
            grid=(num_blocks,),
            in_specs=[
                pl.BlockSpec((block_b, S, H), lambda i: (i, 0, 0)),
                w_spec,
                pl.BlockSpec((1, H), lambda i: (0, 0)),
                pl.BlockSpec((1, H), lambda i: (0, 0)),
            ],
            out_specs=pl.BlockSpec((block_b, H), lambda i: (i, 0)),
        ),
        compiler_params=pltpu.CompilerParams(
            dimension_semantics=("parallel",),
            vmem_limit_bytes=32 * 1024 * 1024,
        ),
        cost_estimate=cost,
    )(x, wt, b2, v2)

    return ctx


def attention_reference(output, w, b, v):
    """Pure-JAX replica of the PyTorch forward, for correctness check."""
    hp = jax.lax.Precision.HIGHEST
    energy = jnp.tanh(jnp.einsum("bsh,oh->bso", output, w, precision=hp) + b)
    scores = jnp.einsum("h,bsh->bs", v, energy, precision=hp)      # (B, S)
    weights = jax.nn.softmax(scores, axis=1)                       # (B, S)
    context = jnp.einsum("bs,bsh->bh", weights, output, precision=hp)
    return context


if __name__ == "__main__":
    B, S, H = 2, 8, 32

    key = jax.random.PRNGKey(0)
    k_x, k_w, k_b, k_v = jax.random.split(key, 4)

    # Deterministic synthetic parameters (shapes from Attention.__init__):
    #   self.attn = nn.Linear(H, H)  -> weight (H, H), bias (H,)
    #   self.v    = nn.Parameter(torch.rand(H)) with uniform(-stdv, stdv)
    stdv = 1.0 / (H ** 0.5)
    w = jax.random.uniform(k_w, (H, H), jnp.float32, -stdv, stdv)
    b = jax.random.uniform(k_b, (H,), jnp.float32, -stdv, stdv)
    v = jax.random.uniform(k_v, (H,), jnp.float32, -stdv, stdv)

    x = jax.random.normal(k_x, (B, S, H), jnp.float32)

    ref = attention_reference(x, w, b, v)

    # f32 kernel path: tight check of the kernel structure (exact softmax).
    ctx_f32 = jax.block_until_ready(
        attention_pallas(x, w, b, v, compute_dtype=jnp.float32))
    assert ctx_f32.shape == (B, H)
    err32 = float(jnp.max(jnp.abs(ctx_f32 - ref)))
    assert err32 < 5e-4, f"f32 path max abs err = {err32}"

    # Default bf16-MXU path: looser tolerance for the bf16 matmul operands.
    ctx = jax.block_until_ready(attention_pallas(x, w, b, v))
    assert ctx.shape == (B, H)
    err16 = float(jnp.max(jnp.abs(ctx - ref)))
    assert err16 < 2e-2, f"bf16 path max abs err = {err16}"

    print("KERNEL_OK")
</pallas_src>

<mosaic_0001>
module attributes {stable_mosaic.version = 11 : i64} {
  func.func @_attention_kernel(%arg0: i32, %arg1: memref<2x8x32xf32, #tpu.memory_space<vmem>>, %arg2: memref<32x32xf32, #tpu.memory_space<vmem>>, %arg3: memref<1x32xf32, #tpu.memory_space<vmem>>, %arg4: memref<1x32xf32, #tpu.memory_space<vmem>>, %arg5: memref<2x32xf32, #tpu.memory_space<vmem>>) attributes {dimension_semantics = [#tpu.dimension_semantics<parallel>], iteration_bounds = array<i64: 1>, scalar_prefetch = 0 : i64, scratch_operands = 0 : i64, tpu.core_type = #tpu.core_type<tc>, window_params = [{transform_indices = @transform_0, window_bounds = array<i64: 2, 8, 32>}, {pipeline_mode = #tpu.pipeline_mode<synchronous>, transform_indices = @transform_1, window_bounds = array<i64: 32, 32>}, {pipeline_mode = #tpu.pipeline_mode<synchronous>, transform_indices = @transform_2, window_bounds = array<i64: 1, 32>}, {pipeline_mode = #tpu.pipeline_mode<synchronous>, transform_indices = @transform_3, window_bounds = array<i64: 1, 32>}, {transform_indices = @transform_4, window_bounds = array<i64: 2, 32>}]} {
    %c0 = arith.constant 0 : index
    %c0_0 = arith.constant 0 : index
    %c0_1 = arith.constant 0 : index
    %0 = vector.load %arg1[%c0, %c0_0, %c0_1] : memref<2x8x32xf32, #tpu.memory_space<vmem>>, vector<2x8x32xf32>
    %1 = vector.shape_cast %0 : vector<2x8x32xf32> to vector<16x32xf32>
    %c0_2 = arith.constant 0 : index
    %c0_3 = arith.constant 0 : index
    %2 = vector.load %arg2[%c0_2, %c0_3] : memref<32x32xf32, #tpu.memory_space<vmem>>, vector<32x32xf32>
    %cst = arith.constant dense<0.000000e+00> : vector<16x32xf32>
    %3 = tpu.matmul %1, %2, %cst {dimension_numbers = #tpu.dot_dimension_numbers<[1], [0], [0], [1], [0, 0, 1, 1], [], []>} : vector<16x32xf32>, vector<32x32xf32>, vector<16x32xf32> -> vector<16x32xf32>
    %c0_4 = arith.constant 0 : index
    %c0_5 = arith.constant 0 : index
    %4 = vector.load %arg3[%c0_4, %c0_5] : memref<1x32xf32, #tpu.memory_space<vmem>>, vector<1x32xf32>
    %5 = vector.broadcast %4 : vector<1x32xf32> to vector<16x32xf32>
    %6 = arith.addf %3, %5 : vector<16x32xf32>
    %7 = math.tanh %6 : vector<16x32xf32>
    %8 = vector.shape_cast %7 : vector<16x32xf32> to vector<2x8x32xf32>
    %c0_6 = arith.constant 0 : index
    %c0_7 = arith.constant 0 : index
    %9 = vector.load %arg4[%c0_6, %c0_7] : memref<1x32xf32, #tpu.memory_space<vmem>>, vector<1x32xf32>
    %10 = vector.shape_cast %9 : vector<1x32xf32> to vector<1x1x32xf32>
    %11 = vector.broadcast %10 : vector<1x1x32xf32> to vector<2x8x32xf32>
    %12 = arith.mulf %8, %11 : vector<2x8x32xf32>
    %cst_8 = arith.constant dense<0.000000e+00> : vector<2x8xf32>
    %13 = vector.multi_reduction <add>, %12, %cst_8 [2] : vector<2x8x32xf32> to vector<2x8xf32>
    %cst_9 = arith.constant dense<0xFF800000> : vector<2xf32>
    %14 = vector.multi_reduction <maximumf>, %13, %cst_9 [1] : vector<2x8xf32> to vector<2xf32>
    %15 = vector.shape_cast %14 : vector<2xf32> to vector<2x1xf32>
    %16 = vector.broadcast %15 : vector<2x1xf32> to vector<2x8xf32>
    %17 = arith.subf %13, %16 : vector<2x8xf32>
    %18 = math.exp %17 : vector<2x8xf32>
    %cst_10 = arith.constant dense<0.000000e+00> : vector<2xf32>
    %19 = vector.multi_reduction <add>, %18, %cst_10 [1] : vector<2x8xf32> to vector<2xf32>
    %20 = vector.shape_cast %19 : vector<2xf32> to vector<2x1xf32>
    %21 = vector.broadcast %20 : vector<2x1xf32> to vector<2x8xf32>
    %22 = arith.divf %18, %21 : vector<2x8xf32>
    %23 = vector.shape_cast %22 : vector<2x8xf32> to vector<2x1x8xf32>
    "tpu.trace_start"() <{level = 10 : i32, message = "bqs,bsh->bqh"}> : () -> ()
    %cst_11 = arith.constant dense<0.000000e+00> : vector<2x1x32xf32>
    %24 = tpu.matmul %23, %0, %cst_11 {dimension_numbers = #tpu.dot_dimension_numbers<[2], [1], [1], [2], [0, 0, 0, 1, 1, 2], [0], [0]>} : vector<2x1x8xf32>, vector<2x8x32xf32>, vector<2x1x32xf32> -> vector<2x1x32xf32>
    "tpu.trace_stop"() : () -> ()
    %25 = vector.shape_cast %24 : vector<2x1x32xf32> to vector<2x32xf32>
    %c0_12 = arith.constant 0 : index
    %c0_13 = arith.constant 0 : index
    %26 = vector.load %arg5[%c0_12, %c0_13] : memref<2x32xf32, #tpu.memory_space<vmem>>, vector<2x32xf32>
    tpu.vector_store %arg5[%c0_12, %c0_13], %25 {strides = array<i32>} : memref<2x32xf32, #tpu.memory_space<vmem>>, vector<2x32xf32>,
    return
  }
  func.func @transform_0(%arg0: i32) -> (i32, i32, i32) {
    %c0_i32 = arith.constant 0 : i32
    %c0_i32_0 = arith.constant 0 : i32
    %c0_i32_1 = arith.constant 0 : i32
    return %arg0, %c0_i32, %c0_i32_0 : i32, i32, i32
  }
  func.func @transform_1(%arg0: i32) -> (i32, i32) {
    %c0_i32 = arith.constant 0 : i32
    %c0_i32_0 = arith.constant 0 : i32
    %c0_i32_1 = arith.constant 0 : i32
    return %c0_i32, %c0_i32_0 : i32, i32
  }
  func.func @transform_2(%arg0: i32) -> (i32, i32) {
    %c0_i32 = arith.constant 0 : i32
    %c0_i32_0 = arith.constant 0 : i32
    %c0_i32_1 = arith.constant 0 : i32
    return %c0_i32, %c0_i32_0 : i32, i32
  }
  func.func @transform_3(%arg0: i32) -> (i32, i32) {
    %c0_i32 = arith.constant 0 : i32
    %c0_i32_0 = arith.constant 0 : i32
    %c0_i32_1 = arith.constant 0 : i32
    return %c0_i32, %c0_i32_0 : i32, i32
  }
  func.func @transform_4(%arg0: i32) -> (i32, i32) {
    %c0_i32 = arith.constant 0 : i32
    %c0_i32_0 = arith.constant 0 : i32
    return %arg0, %c0_i32 : i32, i32
  }
}

</mosaic_0001>

<bundles_post_ra>
// kernel: tpu_custom_call.1
= control target key start
LH: loop header
LB: loop body
LE: loop exit
PB: predicated region body
PF: predicated region fallthrough
CT: control target
= control target key end

     0   :  { %9 = vsyncpa [#allocation3], 0  ;;  %s645_s0 = inlined_call_operand.hbm [shape: f32[2,8,32], index: 0, kind: input, shape index: {}]   ;;  %s646_s1 = inlined_call_operand.hbm [shape: f32[32,32], index: 1, kind: input, shape index: {}]   ;;  %s647_s2 = inlined_call_operand.vmem [shape: f32[1,32], index: 2, kind: input, shape index: {}]   ;;  %s648_s3 = inlined_call_operand.vmem [shape: f32[1,32], index: 3, kind: input, shape index: {}]   ;;  %s649_s4 = inlined_call_operand.hbm [shape: f32[2,32], index: 4, kind: output, shape index: {}]  }
   0x1   :  { %10 = vsyncpa [#allocation6], 0 }
   0x2   :  { %11 = vsyncpa [#allocation4], 0  ;;  %s553_s15 = smov [#allocation2]   ;;  %s481_s19 = scalar_lea.hbm %s645_s0, 256 }
   0x3   :  { %s17_s16 = sshll.u32 %s553_s15, 4  ;;  %p482_p0 = scmp.ne.s32.totalorder %s645_s0, %s481_s19  ;;  %s18_s16 = int_to_ptr.vmem [resolvable:$true] %s17_s16 }
   0x4   :  { %p485_p1 = scmp.lt.u32.totalorder %s481_s19, %s645_s0 }
   0x6   :  { %p487_p2 = pnand %p485_p1, %p482_p0 }
   0x8   :  { %490 = shalt.err (!%p487_p2)
}
   0x9   :  { %s491_s24 = scalar_lea.vmem %s18_s16, 256  ;;  %p496_p4 = scmp.lt.s32.totalorder %s18_s16, %s18_s16 }
   0xa   :  { %p492_p3 = scmp.ne.s32.totalorder %s18_s16, %s491_s24  ;;  %p497_p5 = scmp.lt.s32.totalorder %s491_s24, %s491_s24 }
   0xc   :  { %p498_p6 = por %p497_p5, %p496_p4 }
   0xe   :  { %p499_p7 = pnand %p498_p6, %p492_p3 }
  0x10   :  { %502 = shalt.err (!%p499_p7)
}
  0x11   :  { %s554_s25 = smov 128   ;;  %s555_s26 = smov 8  }
  0x12   :  { %23 = dma.hbm_to_vmem [thread:$0]  %s645_s0, 256, %s18_s16, [#allocation3], %s554_s25, %s554_s25, %s555_s26  }
  0x13   :  { %s556_s29 = smov [#allocation5]   ;;  %s503_s7 = scalar_lea.hbm %s646_s1, 512 }
  0x14   :  { %s29_s30 = sshll.u32 %s556_s29, 4  ;;  %p504_p8 = scmp.ne.s32.totalorder %s646_s1, %s503_s7  ;;  %s30_s30 = int_to_ptr.vmem [resolvable:$true] %s29_s30 }
  0x15   :  { %p507_p9 = scmp.lt.u32.totalorder %s503_s7, %s646_s1 }
  0x17   :  { %p509_p10 = pnand %p507_p9, %p504_p8 }
  0x19   :  { %512 = shalt.err (!%p509_p10)
}
  0x1a   :  { %s513_s12 = scalar_lea.vmem %s30_s30, 512  ;;  %p518_p12 = scmp.lt.s32.totalorder %s30_s30, %s30_s30 }
  0x1b   :  { %p514_p11 = scmp.ne.s32.totalorder %s30_s30, %s513_s12  ;;  %p519_p13 = scmp.lt.s32.totalorder %s513_s12, %s513_s12 }
  0x1d   :  { %p520_p0 = por %p519_p13, %p518_p12 }
  0x1f   :  { %p521_p1 = pnand %p520_p0, %p514_p11 }
  0x21   :  { %524 = shalt.err (!%p521_p1)
}
  0x22   :  { %35 = dma.hbm_to_vmem [thread:$0]  %s646_s1, 512, %s30_s30, [#allocation6], %s554_s25, %s554_s25, %s555_s26  }
  0x23   :  { %547 = dma.done.wait [#allocation3], 256  }
  0x24   :  { %548 = vsyncadd [#allocation3], 4294967040 }
  0x25   :  { %549 = dma.done.wait [#allocation6], 512  }
  0x26   :  { %550 = vsyncadd [#allocation6], 4294966784  ;;  %vm59_vm0 = vcmask 261120   ;;  %v48_v0 = vld [vmem:[#allocation5] sm:$0xff]  ;;  %v49_v1 = vld [vmem:[#allocation5 + $0x8] sm:$0xff]  ;;  %v160_v20 = vlaneseq  ;;  %vm170_vm1 = vcmask 1041409  }
  0x27   :  { %v50_v2 = vld [vmem:[#allocation5 + $0x10] sm:$0xff]  ;;  %v451_v3 = vpack.c.bf16 %v49_v1, %v48_v0  ;;  %v51_v4 = vld [vmem:[#allocation5 + $0x18] sm:$0xff]  ;;  %vm173_vm2 = vcmask 58368   ;;  %v557_v30 = vmov 0   ;;  %v558_v48 = vmov 0.0  }
  0x28   :  { %v610_v5 = vld [vmem:[#allocation2] sm:$0xff]  ;;  %v455_v6 = vpack.c.bf16 %v51_v4, %v50_v2  ;;  %v614_v7 = vld [vmem:[#allocation2 + $0x8] sm:$0xff]  ;;  %v161_v21 = vand.u32 127, %v160_v20  ;;  %v163_v22 = vshrl.u32 %v160_v20, 7  ;;  %468 = vset.pattern.permute.xlu0 %v557_v30  ;;  %467 = vset.pattern.permute.xlu1 %v557_v30  ;;  %vm559_vm3 = vmmov 0  }
  0x29   :  { %438 = vmatprep.mubr.msk.f32.mxu0 %vm59_vm0, %v610_v5  ;;  %452 = vmatprep.subr.bf16.mxu0 %v451_v3  ;;  %v414_v8 = vld [vmem:[%s647_s2] ss:$0 sm:$0xff]  ;;  %vm238_vm4 = vcmask 64512   ;;  %s560_s2 = smov [#allocation7]   ;;  %vm396_vm5 = vcmask 254976  }
  0x2a   :  { %454 = vmatpush3.bf16.msra.mxu0 %v451_v3  ;;  %v417_v13 = vld [vmem:[%s648_s3] ss:$0 sm:$0xff]  ;;  %v164_v24 = vsub.s32 %v161_v21, %v163_v22  ;;  %v180_v31 = vsub.s32 0, %v163_v22  ;;  %v184_v32 = vsub.s32 1, %v163_v22  ;;  %441 = vmatprep.subr.mxu1 %v558_v48  ;;  %s404_s3 = sshll.u32 %s560_s2, 4  ;;  %s405_s3 = int_to_ptr.vmem [resolvable:$true] %s404_s3 }
  0x2b   :  { %456 = vmatprep.subr.bf16.mxu0 %v455_v6  ;;  %442 = vmatpush3.msra.mxu1 %v610_v5  ;;  %s525_s17 = scalar_lea.vmem %s405_s3, 32  ;;  %p530_p3 = scmp.lt.s32.totalorder %s405_s3, %s405_s3 }
  0x2c   :  { %446 = vmatprep.subr.mxu1 %v558_v48  ;;  %443 = vmatprep.mubr.msk.f32.mxu1 %vm559_vm3, %v558_v48  ;;  %p526_p2 = scmp.ne.s32.totalorder %s405_s3, %s525_s17  ;;  %p531_p4 = scmp.lt.s32.totalorder %s525_s17, %s525_s17 }
  0x2e   :  { %458 = vmatpush3.bf16.msra.mxu0 %v455_v6  ;;  %p532_p5 = por %p531_p4, %p530_p3 }
  0x30   :  { %p533_p6 = pnand %p532_p5, %p526_p2 }
  0x31   :  { %439 = vmatmul.mubr.msk.f32.vlgmr.msra.gmra.mrb[0].mxu0 %vm59_vm0, %v614_v7 }
 0x104   :  { %v440_v9 = vpop.f32.mrb[0].mxu0 }
 0x105   :  { %v138_v10 = vadd.f32 %v440_v9, %v414_v8  ;;  %v132_v11 = vpop.f32.mrb[1].mxu0 }
 0x106   :  { %v133_v12 = vadd.f32 %v414_v8, %v132_v11 }
 0x107   :  { %469 = vtanh.f32 %v138_v10 }
 0x108   :  { %471 = vtanh.f32 %v133_v12 }
 0x111   :  { %v470_v14 = vpop.eup %469 }
 0x112   :  { %v472_v15 = vpop.eup %471  ;;  %v151_v18 = vmul.f32 %v470_v14, %v417_v13 }
 0x113   :  { %v150_v16 = vmul.f32 %v472_v15, %v417_v13 }
 0x114   :  { %v155_v19 = vsel %vm59_vm0, %v151_v18, 0.0 }
 0x115   :  { %v152_v17 = vsel %vm59_vm0, %v150_v16, 0.0 }
 0x116   :  { %153 = vadd.xlane.f32.xlu0 %v152_v17 }
 0x11a   :  { %156 = vadd.xlane.f32.xlu0 %v155_v19 }
 0x1a3   :  { %v154_v23 = vpop.xlane.xlu0 %153 }
 0x1a4   :  { %v165_v26 = vrot.slane %v154_v23, %v164_v24 }
 0x1a7   :  { %v157_v25 = vpop.xlane.xlu0 %156 }
 0x1a8   :  { %v169_v27 = vrot.slane %v157_v25, %v164_v24 }
 0x1aa   :  { %v171_v28 = vsel %vm170_vm1, %v169_v27, %v165_v26 }
 0x1ab   :  { %v174_v29 = vsel %vm173_vm2, %v171_v28, -inf }
 0x1ac   :  { %175 = vmax.xlane.f32.xlu1 %v174_v29 }
 0x239   :  { %v176_v33 = vpop.xlane.xlu1 %175 }
 0x23a   :  { %v181_v34 = vrot.slane %v176_v33, %v180_v31  ;;  %v185_v35 = vrot.slane %v176_v33, %v184_v32 }
 0x23c   :  { %v188_v36 = vsub.f32 %v154_v23, %v181_v34  ;;  %v189_v37 = vsub.f32 %v157_v25, %v185_v35 }
 0x23e   :  { %v190_v38 = vmul.f32 1.442695, %v188_v36  ;;  %v192_v39 = vmul.f32 1.442695, %v189_v37 }
 0x240   :  { %473 = vpow2.f32 %v190_v38 }
 0x241   :  { %475 = vpow2.f32 %v192_v39 }
 0x24a   :  { %v474_v40 = vpop.eup %473 }
 0x24b   :  { %v476_v41 = vpop.eup %475  ;;  %197 = vperm.xlu1 %467, %v474_v40  }
 0x24c   :  { %200 = vperm.xlu0 %468, %v476_v41  }
 0x2ca   :  { %v198_v42 = vpop.permute.xlu1 %197 }
 0x2cb   :  { %v201_v43 = vpop.permute.xlu0 %200  ;;  %v205_v44 = vrot.slane %v198_v42, %v164_v24 }
 0x2cc   :  { %v209_v45 = vrot.slane %v201_v43, %v164_v24 }
 0x2ce   :  { %v210_v46 = vsel %vm170_vm1, %v209_v45, %v205_v44 }
 0x2cf   :  { %v212_v47 = vsel %vm173_vm2, %v210_v46, 0.0 }
 0x2d0   :  { %213 = vadd.xlane.f32.xlu1 %v212_v47 }
 0x35d   :  { %v214_v49 = vpop.xlane.xlu1 %213 }
 0x35e   :  { %v219_v50 = vrot.slane %v214_v49, %v180_v31  ;;  %v223_v51 = vrot.slane %v214_v49, %v184_v32 }
 0x360   :  { %477 = vrcp.f32 %v219_v50 }
 0x361   :  { %479 = vrcp.f32 %v223_v51 }
 0x36a   :  { %v478_v52 = vpop.eup %477 }
 0x36b   :  { %v227_v53 = vmul.f32 %v478_v52, %v474_v40  ;;  %v480_v54 = vpop.eup %479 }
 0x36c   :  { %v229_v55 = vmul.f32 %v480_v54, %v476_v41 }
 0x36d   :  { %232 = vperm.xlu0 %468, %v227_v53  }
 0x371   :  { %313 = vperm.xlu0 %468, %v229_v55  }
 0x3ec   :  { %v233_v56 = vpop.permute.xlu0 %232 }
 0x3ed   :  { %v237_v57 = vrot.slane %v233_v56, %v164_v24 }
 0x3ef   :  { %444 = vmatmul.mubr.msk.f32.vlgmr.msra.gmra.mrb[0].mxu1 %vm238_vm4, %v237_v57 }
 0x3f0   :  { %447 = vmatpush3.msra.mxu1 %v614_v7  ;;  %v314_v58 = vpop.permute.xlu0 %313  ;;  %448 = vmatprep.mubr.msk.f32.mxu1 %vm559_vm3, %v558_v48 }
 0x3f1   :  { %v318_v59 = vrot.slane %v314_v58, %v164_v24 }
 0x3f3   :  { %449 = vmatmul.mubr.msk.f32.vlgmr.msra.gmra.mrb[2].mxu1 %vm238_vm4, %v318_v59 }
 0x4c2   :  { %v307_v60 = vpop.f32.mrb[0].mxu1 }
 0x4c3   :  { %v445_v61 = vpop.f32.mrb[1].mxu1 }
 0x4c6   :  { %v387_v62 = vpop.f32.mrb[2].mxu1 }
 0x4c7   :  { %v393_v63 = vrot.slane %v387_v62, 7  ;;  %v450_v0 = vpop.f32.mrb[3].mxu1 }
 0x4c9   :  { %v394_v1 = vsel %vm170_vm1, %v393_v63, %v307_v60 }
 0x4ca   :  { %397 = vst.msk [vmem:[#allocation7] sm:$0x3] %vm396_vm5, %v394_v1 }
 0x4cb   :  { %536 = shalt.err (!%p533_p6)
}
 0x4cc   :  { %s537_s20 = scalar_lea.hbm %s649_s4, 32 }
 0x4cd   :  { %p538_p7 = scmp.ne.s32.totalorder %s649_s4, %s537_s20  ;;  %p541_p8 = scmp.lt.u32.totalorder %s537_s20, %s649_s4 }
 0x4cf   :  { %p543_p9 = pnand %p541_p8, %p538_p7 }
 0x4d1   :  { %546 = shalt.err (!%p543_p9)
}
 0x4d2   :  { %407 = dma.vmem_to_hbm [thread:$0]  %s405_s3, 32, %s649_s4, [#allocation4]  }
 0x4d3   :  { %551 = dma.done.wait [#allocation4], 32  }
 0x4d4   :  { %552 = vsyncadd [#allocation4], 4294967264 }
 0x4d5   :  { %411 = vsyncpa [#allocation3], 1 }
 0x4d6   :  { %412 = vsyncpa [#allocation6], 1 }
 0x4d7   :  { %413 = vsyncpa [#allocation4], 1 }

</bundles_post_ra>
